<compile_context>
chip_gen: v5e
topology: v5e:2x2
jax: 0.10.0
libtpu: 0.0.40
codegen_flags: <defaults>
</compile_context>

<pallas_src>
import jax
import jax.numpy as jnp
from jax.experimental import pallas as pl
from jax.experimental.pallas import tpu as pltpu


def _liner_concat_kernel(x_ref, h_ref, wx_ref, wh_ref, b_ref, o_ref):
    # x_ref: (tm, F_in), h_ref: (tm, F_out)
    # wx_ref: (1, F_in, tn), wh_ref: (1, F_out, tn), b_ref: (1, 1, tn)
    # o_ref: (1, tm, tn)
    acc = jnp.dot(x_ref[...], wx_ref[0], preferred_element_type=jnp.float32)
    acc += jnp.dot(h_ref[...], wh_ref[0], preferred_element_type=jnp.float32)
    o_ref[0] = (acc + b_ref[0]).astype(o_ref.dtype)


def _pick_tile(dim, preferred):
    """Largest clean tile: full dim for small/indivisible sizes, else `preferred`."""
    if dim <= preferred:
        return dim
    if dim % preferred == 0:
        return preferred
    return dim  # fall back to full-dim (BlockSpec full-array exemption)


def liner_concat_forward(x, h, w_x, w_h, bias, *, tm_pref=256, tn_pref=512):
    """x: (B, F_in), h: (B, F_out),
    w_x: (4, F_in, out), w_h: (4, F_out, out), bias: (4, 1, out).
    Returns a tuple of 4 gate tensors, each (B, out)."""
    B, F_in = x.shape
    _, F_out = h.shape
    out_size = w_x.shape[-1]

    tm = _pick_tile(B, tm_pref)
    tn = _pick_tile(out_size, tn_pref)
    grid = (4, B // tm, out_size // tn)

    itemsize = x.dtype.itemsize
    flops = 2 * B * (F_in + F_out) * 4 * out_size
    bytes_accessed = itemsize * (
        B * F_in + B * F_out                      # activations
        + 4 * (F_in + F_out) * out_size           # weights
        + 4 * out_size                            # bias
        + 4 * B * out_size                        # output
    )

    out = pl.pallas_call(
        _liner_concat_kernel,
        out_shape=jax.ShapeDtypeStruct((4, B, out_size), x.dtype),
        grid_spec=pltpu.PrefetchScalarGridSpec(
            num_scalar_prefetch=0,
            grid=grid,
            in_specs=[
                pl.BlockSpec((tm, F_in), lambda g, i, j: (i, 0)),
                pl.BlockSpec((tm, F_out), lambda g, i, j: (i, 0)),
                pl.BlockSpec((1, F_in, tn), lambda g, i, j: (g, 0, j)),
                pl.BlockSpec((1, F_out, tn), lambda g, i, j: (g, 0, j)),
                pl.BlockSpec((1, 1, tn), lambda g, i, j: (g, 0, j)),
            ],
            out_specs=pl.BlockSpec((1, tm, tn), lambda g, i, j: (g, i, j)),
        ),
        compiler_params=pltpu.CompilerParams(
            dimension_semantics=("parallel", "parallel", "parallel"),
        ),
        cost_estimate=pl.CostEstimate(
            flops=flops, transcendentals=0, bytes_accessed=bytes_accessed
        ),
    )(x, h, w_x, w_h, bias)

    # Leading-axis views only (no lane-misaligned last-dim slicing).
    return tuple(out[g] for g in range(4))


def convert_torch_params(weight, bias, input_size, output_size):
    """Convert PyTorch nn.Linear params to the per-gate kernel layout.

    weight: (4*out, in+out)  (PyTorch layout), bias: (4*out,).
    Returns w_x (4, in, out), w_h (4, out_prev, out), bias (4, 1, out).
    """
    K = input_size + output_size
    w = weight.reshape(4, output_size, K)           # gate-major rows of `weight`
    w = jnp.transpose(w, (0, 2, 1))                 # (4, K, out) == columns of weight.T
    w_x = w[:, :input_size, :]
    w_h = w[:, input_size:, :]
    b = bias.reshape(4, 1, output_size)
    return w_x, w_h, b


if __name__ == "__main__":
    B = 8
    input_size = 32
    output_size = 32

    key = jax.random.PRNGKey(0)
    k_x, k_h, k_w, k_b = jax.random.split(key, 4)

    x = jax.random.normal(k_x, (B, input_size), dtype=jnp.float32)
    h = jax.random.normal(k_h, (B, output_size), dtype=jnp.float32)

    fan_in = input_size + output_size
    bound = 1.0 / (fan_in ** 0.5)
    # PyTorch nn.Linear layout: weight (4*out, in+out), bias (4*out,).
    weight = jax.random.uniform(
        k_w, (4 * output_size, fan_in), dtype=jnp.float32, minval=-bound, maxval=bound
    )
    bias = jax.random.uniform(
        k_b, (4 * output_size,), dtype=jnp.float32, minval=-bound, maxval=bound
    )

    w_x, w_h, b = convert_torch_params(weight, bias, input_size, output_size)

    gates = liner_concat_forward(x, h, w_x, w_h, b)
    gates = jax.block_until_ready(gates)

    # Reference (exactly the PyTorch math): concat -> Linear -> split(dim=1).
    xh = jnp.concatenate([x, h], axis=1)
    ref = xh @ weight.T + bias
    for g in range(4):
        r = ref[:, g * output_size:(g + 1) * output_size]
        assert gates[g].shape == (B, output_size)
        assert jnp.allclose(gates[g], r, atol=1e-5, rtol=1e-5)

    print("KERNEL_OK")
</pallas_src>

<mosaic_0001>
module attributes {stable_mosaic.version = 11 : i64} {
  func.func @_liner_concat_kernel(%arg0: i32, %arg1: i32, %arg2: i32, %arg3: memref<8x32xf32, #tpu.memory_space<vmem>>, %arg4: memref<8x32xf32, #tpu.memory_space<vmem>>, %arg5: memref<1x32x32xf32, #tpu.memory_space<vmem>>, %arg6: memref<1x32x32xf32, #tpu.memory_space<vmem>>, %arg7: memref<1x1x32xf32, #tpu.memory_space<vmem>>, %arg8: memref<1x8x32xf32, #tpu.memory_space<vmem>>) attributes {dimension_semantics = [#tpu.dimension_semantics<parallel>, #tpu.dimension_semantics<parallel>, #tpu.dimension_semantics<parallel>], iteration_bounds = array<i64: 4, 1, 1>, scalar_prefetch = 0 : i64, scratch_operands = 0 : i64, tpu.core_type = #tpu.core_type<tc>, window_params = [{transform_indices = @transform_0, window_bounds = array<i64: 8, 32>}, {transform_indices = @transform_1, window_bounds = array<i64: 8, 32>}, {transform_indices = @transform_2, window_bounds = array<i64: 1, 32, 32>}, {transform_indices = @transform_3, window_bounds = array<i64: 1, 32, 32>}, {transform_indices = @transform_4, window_bounds = array<i64: 1, 1, 32>}, {transform_indices = @transform_5, window_bounds = array<i64: 1, 8, 32>}]} {
    %c0 = arith.constant 0 : index
    %c0_0 = arith.constant 0 : index
    %0 = vector.load %arg3[%c0, %c0_0] : memref<8x32xf32, #tpu.memory_space<vmem>>, vector<8x32xf32>
    %c0_1 = arith.constant 0 : index
    %c0_2 = arith.constant 0 : index
    %c0_3 = arith.constant 0 : index
    %1 = vector.load %arg5[%c0_1, %c0_2, %c0_3] : memref<1x32x32xf32, #tpu.memory_space<vmem>>, vector<1x32x32xf32>
    %2 = vector.shape_cast %1 : vector<1x32x32xf32> to vector<32x32xf32>
    %cst = arith.constant dense<0.000000e+00> : vector<8x32xf32>
    %3 = tpu.matmul %0, %2, %cst {dimension_numbers = #tpu.dot_dimension_numbers<[1], [0], [0], [1], [0, 0, 1, 1], [], []>} : vector<8x32xf32>, vector<32x32xf32>, vector<8x32xf32> -> vector<8x32xf32>
    %c0_4 = arith.constant 0 : index
    %c0_5 = arith.constant 0 : index
    %4 = vector.load %arg4[%c0_4, %c0_5] : memref<8x32xf32, #tpu.memory_space<vmem>>, vector<8x32xf32>
    %c0_6 = arith.constant 0 : index
    %c0_7 = arith.constant 0 : index
    %c0_8 = arith.constant 0 : index
    %5 = vector.load %arg6[%c0_6, %c0_7, %c0_8] : memref<1x32x32xf32, #tpu.memory_space<vmem>>, vector<1x32x32xf32>
    %6 = vector.shape_cast %5 : vector<1x32x32xf32> to vector<32x32xf32>
    %cst_9 = arith.constant dense<0.000000e+00> : vector<8x32xf32>
    %7 = tpu.matmul %4, %6, %cst_9 {dimension_numbers = #tpu.dot_dimension_numbers<[1], [0], [0], [1], [0, 0, 1, 1], [], []>} : vector<8x32xf32>, vector<32x32xf32>, vector<8x32xf32> -> vector<8x32xf32>
    %8 = arith.addf %3, %7 : vector<8x32xf32>
    %c0_10 = arith.constant 0 : index
    %c0_11 = arith.constant 0 : index
    %c0_12 = arith.constant 0 : index
    %9 = vector.load %arg7[%c0_10, %c0_11, %c0_12] : memref<1x1x32xf32, #tpu.memory_space<vmem>>, vector<1x1x32xf32>
    %10 = vector.shape_cast %9 : vector<1x1x32xf32> to vector<1x32xf32>
    %11 = vector.broadcast %10 : vector<1x32xf32> to vector<8x32xf32>
    %12 = arith.addf %8, %11 : vector<8x32xf32>
    %c0_13 = arith.constant 0 : index
    %c0_14 = arith.constant 0 : index
    %c0_15 = arith.constant 0 : index
    %13 = vector.load %arg8[%c0_13, %c0_14, %c0_15] : memref<1x8x32xf32, #tpu.memory_space<vmem>>, vector<1x8x32xf32>
    %14 = vector.shape_cast %13 : vector<1x8x32xf32> to vector<8x32xf32>
    %15 = vector.shape_cast %12 : vector<8x32xf32> to vector<1x8x32xf32>
    tpu.vector_store %arg8[%c0_13, %c0_14, %c0_15], %15 {strides = array<i32>} : memref<1x8x32xf32, #tpu.memory_space<vmem>>, vector<1x8x32xf32>,
    return
  }
  func.func @transform_0(%arg0: i32, %arg1: i32, %arg2: i32) -> (i32, i32) {
    %c0_i32 = arith.constant 0 : i32
    %c0_i32_0 = arith.constant 0 : i32
    return %arg1, %c0_i32 : i32, i32
  }
  func.func @transform_1(%arg0: i32, %arg1: i32, %arg2: i32) -> (i32, i32) {
    %c0_i32 = arith.constant 0 : i32
    %c0_i32_0 = arith.constant 0 : i32
    return %arg1, %c0_i32 : i32, i32
  }
  func.func @transform_2(%arg0: i32, %arg1: i32, %arg2: i32) -> (i32, i32, i32) {
    %c0_i32 = arith.constant 0 : i32
    %c0_i32_0 = arith.constant 0 : i32
    return %arg0, %c0_i32, %arg2 : i32, i32, i32
  }
  func.func @transform_3(%arg0: i32, %arg1: i32, %arg2: i32) -> (i32, i32, i32) {
    %c0_i32 = arith.constant 0 : i32
    %c0_i32_0 = arith.constant 0 : i32
    return %arg0, %c0_i32, %arg2 : i32, i32, i32
  }
  func.func @transform_4(%arg0: i32, %arg1: i32, %arg2: i32) -> (i32, i32, i32) {
    %c0_i32 = arith.constant 0 : i32
    %c0_i32_0 = arith.constant 0 : i32
    return %arg0, %c0_i32, %arg2 : i32, i32, i32
  }
  func.func @transform_5(%arg0: i32, %arg1: i32, %arg2: i32) -> (i32, i32, i32) {
    %c0_i32 = arith.constant 0 : i32
    return %arg0, %arg1, %arg2 : i32, i32, i32
  }
}

</mosaic_0001>

<bundles_post_ra>
// kernel: tpu_custom_call.1
= control target key start
LH: loop header
LB: loop body
LE: loop exit
PB: predicated region body
PF: predicated region fallthrough
CT: control target
= control target key end

     0   :  { %s1200_s0 = inlined_call_operand.hbm [shape: f32[8,32], index: 0, kind: input, shape index: {}]   ;;  %s1201_s1 = inlined_call_operand.hbm [shape: f32[8,32], index: 1, kind: input, shape index: {}]   ;;  %s1202_s2 = inlined_call_operand.hbm [shape: f32[4,32,32], index: 2, kind: input, shape index: {}]   ;;  %s1203_s3 = inlined_call_operand.hbm [shape: f32[4,32,32], index: 3, kind: input, shape index: {}]   ;;  %s1204_s4 = inlined_call_operand.hbm [shape: f32[4,1,32], index: 4, kind: input, shape index: {}]   ;;  %s1205_s5 = inlined_call_operand.hbm [shape: f32[4,8,32], index: 5, kind: output, shape index: {}]  }
   0x1   :  { %1214 = sst [smem:[#allocation21_spill]] %s1200_s0 }
   0x2   :  { %1215 = sst [smem:[#allocation22_spill]] %s1202_s2 }
   0x3   :  { %10 = vsyncpa [#allocation3], 0 }
   0x4   :  { %11 = vsyncpa [#allocation6], 0 }
   0x5   :  { %12 = vsyncpa [#allocation4], 0 }
   0x6   :  { %14 = vsyncpa [#allocation4 + $0x1], 0  ;;  %s1015_s18 = smov 0   ;;  %s1017_s19 = smov 0  }
   0x7   :  { %s1019_s20 = smov 0   ;;  %s1021_s21 = smov 0  }
   0x8   :  { %s1023_s22 = smov 0   ;;  %s1025_s23 = smov 0  }
   0x9 LB: > { %1216 = sst [smem:[#allocation15_spill]] %s959_s18  ;;  %s1046_s24 = sadd.s32 4294967295, %s979_s23   ;;  %s979_s23 = sphi %s1025_s23, %s20_s23   ;;  %s975_s22 = sphi %s1023_s22, %s1242_s22   ;;  %s971_s21 = sphi %s1021_s21, %s1241_s21   ;;  %s967_s20 = sphi %s1019_s20, %s1240_s20   ;;  %s963_s19 = sphi %s1017_s19, %s1239_s19   ;;  %s959_s18 = sphi %s1015_s18, %s1238_s18  }
   0xa   : > { %1217 = sst [smem:[#allocation16_spill]] %s979_s23  ;;  %s618_s25 = sadd.s32 4294967294, %s979_s23  }
   0xb   : > { %s100_s26 = sadd.s32 1, %s967_s20  ;;  %p107_p0 = scmp.ne.s32.totalorder %s967_s20, %s963_s19 }
   0xc   : > { %p108_p1 = scmp.eq.s32.totalorder %s979_s23, 0  ;;  %p113_p2 = scmp.ne.s32.totalorder %s963_s19, %s959_s18 }
   0xd   : > { %p114_p3 = scmp.eq.s32.totalorder %s1046_s24, 0  ;;  %p197_p4 = scmp.eq.s32.totalorder %s1046_s24, 3 }
   0xe   : > { %p1057_p5 = por %p108_p1, %p107_p0  ;;  %p203_p6 = scmp.eq.s32.totalorder %s618_s25, 3 }
   0xf   : > { %p1063_p7 = por %p114_p3, %p113_p2  ;;  %p1067_p8 = por %p197_p4, %p107_p0 }
  0x10   : > { %p1071_p9 = por %p203_p6, %p113_p2  ;;  %p619_p10 = scmp.ge.s32.totalorder %s979_s23, 1 }
  0x11   : > { %s1220_s29 = scalar_select %p1067_p8, 1, 0 }
  0x12   : > { %s1222_s30 = scalar_select %p1071_p9, 1, 0 }
  0x13   : > { %1221 = sst [smem:[#allocation17_spill]] %s1220_s29  ;;  %p210_p11 = scmp.lt.s32.totalorder %s979_s23, 5 }
  0x14   : > { %1223 = sst [smem:[#allocation18_spill]] %s1222_s30  ;;  %s981_s10 = smov [#allocation2]  }
  0x15   : > { %s1224_s0 = sld [smem:[#allocation21_spill]]  ;;  %p1080_p12 = pnand %p619_p10, %p210_p11 }
  0x16   : > { %s226_s11 = sshll.u32 %s981_s10, 4  ;;  %p682_p0 = scmp.lt.s32.totalorder %s979_s23, 4  ;;  %s227_s11 = int_to_ptr.vmem [resolvable:$true] %s226_s11 }
  0x17   : > { %p659_p13 = pneg %p1080_p12  ;;  %s39_s14 = sadd.s32 1, %s975_s22 }
  0x18   : > { %p1095_p2 = pnand %p682_p0, %p1057_p5  ;;  %p41_p4 = scmp.ge.s32.totalorder %s39_s14, 4 }
  0x19   : > { %p1089_p1 = pnand %p659_p13, %p114_p3  ;;  %s251_s15 = sand.u32 1, %s979_s23  }
  0x1a   : > { %s1244_s14 = smov (%p41_p4, %s39_s14), 0  ;;  %s1209_s16 = sand.u32 1, %s967_s20  }
  0x1b   : > { %s224_s8 = sshll.u32 %s1224_s0, 4  ;;  %1228 = sst [smem:[#allocation19_spill]] %s1244_s14  ;;  %s225_s8 = int_to_ptr.hbm [resolvable:$true] %s224_s8 }
  0x1c   : > { %662 = dma.hbm_to_vmem [thread:$0]  (!%p1089_p1), %s225_s8, 128, %s227_s11, [#allocation3]  }
  0x1d   : > { %s95_s17 = ssub.s32 %s975_s22, %s1244_s14  ;;  %s623_s25 = sshll.u32 %s1209_s16, 5 }
  0x1e   : > { %p98_p6 = scmp.eq.s32.totalorder %s95_s17, 0  ;;  %s641_s27 = sshll.u32 %s975_s22, 5 }
  0x1f   : > { %s255_s6 = scalar_lea.vmem [#allocation7], %s623_s25  ;;  %s1230_s2 = sld [smem:[#allocation22_spill]] }
  0x20   : > { %s264_s7 = sshll.u32 %s255_s6, 4  ;;  %s252_s18 = scalar_lea.sflag [#allocation3], %s251_s15  ;;  %s265_s7 = int_to_ptr.vmem [resolvable:$true] %s264_s7 }
  0x21   : > { %s1114_s10 = scalar_select %p98_p6, %s967_s20, %s100_s26  }
  0x22   : > { %s982_s14 = smov 128   ;;  %s983_s16 = smov 8  }
  0x23   : > { %1229 = sst [smem:[#allocation20_spill]] %s1114_s10  ;;  %s284_s26 = scalar_lea.hbm %s1203_s3, %s641_s27 }
  0x24   : > { %s285_s10 = sshll.u32 %s284_s26, 4  ;;  %s278_s23 = scalar_lea.vmem [#allocation8], %s623_s25  ;;  %s286_s10 = int_to_ptr.hbm [resolvable:$true] %s285_s10 }
  0x25   : > { %s261_s8 = scalar_lea.hbm %s1230_s2, %s641_s27  ;;  %s287_s29 = sshll.u32 %s278_s23, 4  ;;  %s288_s29 = int_to_ptr.vmem [resolvable:$true] %s287_s29 }
  0x26   : > { %s262_s11 = sshll.u32 %s261_s8, 4  ;;  %s238_s15 = sshll.u32 %s1201_s1, 4  ;;  %s263_s11 = int_to_ptr.hbm [resolvable:$true] %s262_s11  ;;  %s239_s15 = int_to_ptr.hbm [resolvable:$true] %s238_s15 }
  0x27   : > { %669 = dma.hbm_to_vmem [thread:$0]  (!%p1095_p2), %s263_s11, 512, %s265_s7, %s252_s18, %s982_s14, %s982_s14, %s983_s16  }
  0x28   : > { %672 = dma.hbm_to_vmem [thread:$0]  (!%p1095_p2), %s286_s10, 512, %s288_s29, %s252_s18, %s982_s14, %s982_s14, %s983_s16  }
  0x29   : > { %s984_s8 = smov [#allocation5]   ;;  %s304_s25 = scalar_lea.hbm %s1204_s4, %s975_s22 }
  0x2a   : > { %s240_s2 = sshll.u32 %s984_s8, 4  ;;  %s1231_s23 = sand.u32 1, %s967_s20   ;;  %s241_s2 = int_to_ptr.vmem [resolvable:$true] %s240_s2 }
  0x2b   : > { %665 = dma.hbm_to_vmem [thread:$0]  (!%p1089_p1), %s239_s15, 128, %s241_s2, [#allocation6]  }
  0x2c   : > { %s300_s11 = scalar_lea.vmem [#allocation9], %s1231_s23  ;;  %s306_s6 = sshll.u32 %s304_s25, 4  ;;  %s307_s6 = int_to_ptr.hbm [resolvable:$true] %s306_s6 }
  0x2d   : > { %s308_s17 = sshll.u32 %s300_s11, 4  ;;  %317 = sbr.rel (%p1080_p12) target bundleno = 199 (0xc7), region = 40  ;;  %s309_s17 = int_to_ptr.vmem [resolvable:$true] %s308_s17 }
  0x2e   : > { %675 = dma.hbm_to_vmem [thread:$0]  (!%p1095_p2), %s307_s6, 16, %s309_s17, %s252_s18  }
  0x32   : > { %942 = dma.done.wait (%p114_p3), [#allocation3], 128  }
  0x33   : > { %944 = vsyncadd (%p114_p3), [#allocation3], 4294967168 }
  0x34   : > { %946 = dma.done.wait (%p114_p3), [#allocation6], 128  }
  0x35   : > { %948 = vsyncadd (%p114_p3), [#allocation6], 4294967168  ;;  %s329_s2 = sand.u32 1, %s1046_s24   ;;  %s1151_s18 = sand.u32 1, %s963_s19  }
  0x36   : > { %s632_s29 = sshll.u32 %s1151_s18, 5  ;;  %s330_s9 = scalar_lea.sflag [#allocation3], %s329_s2 }
  0x37   : > { %s333_s12 = scalar_lea.vmem [#allocation7], %s632_s29 }
  0x38   : > { %950 = dma.done.wait (%p1063_p7), %s330_s9, 1040  }
  0x39   : > { %952 = vsyncadd (%p1063_p7), %s330_s9, 4294966256  ;;  %s343_s13 = scalar_lea.vmem [#allocation8], %s632_s29  ;;  %v393_v1 = vld [vmem:[%s333_s12 + $0x18] sm:$0xff]  ;;  %v392_v3 = vld [vmem:[%s333_s12 + $0x10] sm:$0xff]  ;;  %vm399_vm0 = vcmask 261120   ;;  %s352_s24 = scalar_lea.vmem [#allocation9], %s1151_s18 }
  0x3a   : > { %v398_v0 = vld [vmem:[%s343_s13 + $0x18] sm:$0xff]  ;;  %v397_v2 = vld [vmem:[%s343_s13 + $0x10] sm:$0xff]  ;;  %438 = vmatpush.msra.mxu1 %v393_v1  ;;  %v396_v4 = vld [vmem:[%s343_s13 + $0x8] sm:$0xff]  ;;  %s634_s28 = sshll.u32 %s1151_s18, 3  ;;  %s638_s14 = sshll.u32 %s971_s21, 3 }
  0x3b   : > { %415 = vmatpush.msra.mxu0 %v398_v0  ;;  %v391_v5 = vld [vmem:[%s333_s12 + $0x8] sm:$0xff]  ;;  %v395_v6 = vld [vmem:[%s343_s13] sm:$0xff]  ;;  %v394_v8 = vld [vmem:[#allocation5] sm:$0xff]  ;;  %s465_s26 = scalar_lea.hbm %s1205_s5, %s638_s14  ;;  %s388_s30 = scalar_lea.vmem [#allocation10], %s634_s28 }
  0x3c   : > { %439 = vmatpush.msra.mxu1 %v392_v3  ;;  %v390_v7 = vld [vmem:[%s333_s12] sm:$0xff]  ;;  %v389_v9 = vld [vmem:[#allocation2] sm:$0xff]  ;;  %s467_s15 = sshll.u32 %s388_s30, 4  ;;  %s469_s8 = sshll.u32 %s465_s26, 4  ;;  %s468_s15 = int_to_ptr.vmem [resolvable:$true] %s467_s15  ;;  %s470_s8 = int_to_ptr.hbm [resolvable:$true] %s469_s8 }
  0x3d   : > { %416 = vmatpush.msra.mxu0 %v397_v2  ;;  %v738_v10 = vld [vmem:[%s352_s24] ss:$0 sm:$0xff]  ;;  %s453_s7 = scalar_lea.sflag [#allocation4], %s1151_s18  ;;  %s903_s27 = sshra.s32 %s470_s8, 4  ;;  %s904_s27 = int_to_ptr.hbm [resolvable:$true] %s903_s27 }
  0x3e   : > { %440 = vmatpush.msra.mxu1 %v391_v5  ;;  %s905_s21 = scalar_lea.hbm %s904_s27, 8  ;;  %s909_s11 = scalar_lea.hbm %s1205_s5, 32 }
  0x3f   : > { %417 = vmatpush.msra.mxu0 %v396_v4  ;;  %p906_p3 = scmp.ne.s32.totalorder %s904_s27, %s905_s21  ;;  %p910_p10 = scmp.lt.s32.totalorder %s904_s27, %s1205_s5 }
  0x40   : > { %441 = vmatpush.msra.mxu1 %v390_v7  ;;  %p911_p11 = scmp.lt.s32.totalorder %s909_s11, %s905_s21 }
  0x41   : > { %418 = vmatpush.msra.mxu0 %v395_v6  ;;  %636 = vmatmul.msk.f32.vlgmr.msra.gmra.mxu1 %vm399_vm0, %v389_v9  ;;  %p907_p5 = pnand %p906_p3, %p1067_p8 }
  0x42   : > { %635 = vmatmul.msk.f32.vlgmr.msra.gmra.mxu0 %vm399_vm0, %v394_v8  ;;  %p912_p12 = por %p911_p11, %p910_p10 }
  0x43   : > { %p908_p7 = pneg %p907_p5 }
  0x45   : > { %p913_p13 = pnand %p912_p12, %p908_p7 }
  0xbe   : > { %v443_v12 = vpop.f32.mrf.mxu1 }
  0xbf   : > { %v420_v11 = vpop.f32.mrf.mxu0 }
  0xc0   : > { %v444_v13 = vadd.f32 %v443_v12, %v420_v11 }
  0xc2   : > { %v450_v14 = vadd.f32 %v738_v10, %v444_v13 }
  0xc4   : > { %451 = vst.msk [vmem:[%s388_s30] sm:$0xff] %vm399_vm0, %v450_v14 }
  0xc5   : > { %916 = shalt.err (!%p913_p13)
}
  0xc6   : > { %657 = dma.vmem_to_hbm [thread:$0]  (%p1067_p8), %s468_s15, 128, %s470_s8, %s453_s7  }
  0xc7 PF: > { %s1233_s2 = sld [smem:[#allocation16_spill]] }
  0xc8   : > { %s1234_s18 = sld [smem:[#allocation15_spill]] }
  0xcd   : > { %p685_p0 = scmp.ge.s32.totalorder %s1233_s2, 2 }
  0xce   : > { %s481_s9 = sand.u32 1, %s1234_s18  }
  0xcf   : > { %p677_p1 = pnand %p685_p0, %p1071_p9  ;;  %s482_s12 = scalar_lea.sflag [#allocation4], %s481_s9 }
  0xd1   : > { %p678_p2 = pneg %p677_p1 }
  0xd3   : > { %954 = dma.done.wait (%p678_p2), %s482_s12, 128  }
  0xd4   : > { %956 = vsyncadd (%p678_p2), %s482_s12, 4294967168  ;;  %s20_s23 = sadd.s32 1, %s1233_s2   ;;  %s1236_s13 = sld [smem:[#allocation20_spill]] }
  0xd5   : > { %p17_p4 = scmp.ge.s32.totalorder %s20_s23, 6   ;;  %s1237_s24 = sld [smem:[#allocation19_spill]] }
  0xd6   : > { %s1238_s18 = smov %s963_s19  ;;  %s1239_s19 = smov %s967_s20 }
  0xd7   : > { %s1241_s21 = smov %s975_s22  ;;  %19 = sbr.rel (!%p17_p4) target bundleno = 9 (0x9), region = 116 }
  0xda   : > { %s1240_s20 = smov %s1236_s13 }
  0xdb   : > { %s1242_s22 = smov %s1237_s24 }
  0xdc   :  { %488 = vsyncpa [#allocation3], 1 }
  0xdd   :  { %490 = vsyncpa [#allocation3 + $0x1], 1 }
  0xde   :  { %491 = vsyncpa [#allocation6], 1 }
  0xdf   :  { %492 = vsyncpa [#allocation4], 1 }
  0xe0   :  { %494 = vsyncpa [#allocation4 + $0x1], 1 }

</bundles_post_ra>
